<compile_context>
chip_gen: v7x
topology: tpu7x:2x2x1
jax: 0.10.0
libtpu: 0.0.40
codegen_flags: <defaults>
</compile_context>

<pallas_src>
import jax
import jax.numpy as jnp
import numpy as np
from jax import lax
from jax.experimental import pallas as pl
from jax.experimental.pallas import tpu as pltpu

IN_D = 2
OUT_D = 2
HIDDEN_D = 8
LANE = 128            # f32 lane width; batch blocks are multiples of this
UNROLL_T_MAX = 64     # fully unroll time loops up to this length


def _bidir_rnn_kernel(x_ref, len_ref, wih_ref, whh_ref, bih_ref,
                      wfc_ref, bfc_ref, out_ref, proj_ref):
    T, _, Bblk = x_ref.shape
    H2 = whh_ref.shape[0]          # 2*H (fwd rows | bwd rows)
    H = H2 // 2
    assert Bblk % LANE == 0
    K = Bblk // LANE               # independent 128-lane batch sub-chunks

    wih = wih_ref[...]             # (2H, in_d)  fwd/bwd stacked on rows
    whh = whh_ref[...]             # (2H, 2H)    block-diagonal
    bih = bih_ref[...]             # (2H, 1)     b_ih + b_hh, fwd|bwd

    # ---- hoisted input projection (weight-on-left, batch-on-lanes) ---------
    # fwd half of recurrent step s consumes x[s]; bwd half consumes x[T-1-s],
    # so the bwd projection of x[t] is written time-reversed at proj[T-1-t].
    def project(t):
        p = jnp.dot(wih, x_ref[t], preferred_element_type=jnp.float32) + bih
        proj_ref[t, :H, :] = p[:H, :]
        proj_ref[T - 1 - t, H:, :] = p[H:, :]

    if T <= UNROLL_T_MAX:
        for t in range(T):
            project(t)
    else:
        def proj_body(t, carry):
            project(t)
            return carry
        lax.fori_loop(0, T, proj_body, 0, unroll=4)

    # ---- hoisted loop invariants --------------------------------------------
    row = lax.broadcasted_iota(jnp.int32, (H2, LANE), 0)
    is_fwd = row < H
    lens = [len_ref[:, k * LANE:(k + 1) * LANE] for k in range(K)]   # (1, LANE)

    # ---- fused fwd/bwd recurrence; K independent chains interleaved --------
    def step(t, hs):
        # fwd rows process time t, bwd rows process time T-1-t
        t_eff = jnp.where(is_fwd, t, T - 1 - t)                      # (2H, LANE)
        new = []
        for k in range(K):
            p = proj_ref[t, :, k * LANE:(k + 1) * LANE]              # (2H, LANE)
            h_new = jnp.tanh(p + jnp.dot(whh, hs[k],
                                         preferred_element_type=jnp.float32))
            # pack_padded_sequence: only update while time < length
            new.append(jnp.where(lens[k] > t_eff, h_new, hs[k]))
        return new

    hs = [jnp.zeros((H2, LANE), jnp.float32) for _ in range(K)]
    if T <= UNROLL_T_MAX:
        for t in range(T):                      # fully unrolled, static indices
            hs = step(t, hs)
    else:
        h_stack = lax.fori_loop(
            0, T, lambda t, hst: jnp.stack(step(t, list(hst)), 0),
            jnp.stack(hs, 0), unroll=2)
        hs = [h_stack[k] for k in range(K)]

    # ---- FC head on cat(h_fwd, h_bwd); full-lane stores per 128-chunk -------
    wfc = wfc_ref[...]              # (out_d, 2H)
    bfc = bfc_ref[...]              # (out_d, 1)
    for k in range(K):
        y = jnp.dot(wfc, hs[k], preferred_element_type=jnp.float32) + bfc
        out_ref[:, k * LANE:(k + 1) * LANE] = y.astype(out_ref.dtype)


def coord_rnn_forward(x, lengths, params):
    """x: (B, T, in_d) float32, lengths: (B,) int; returns (B, out_d) float32."""
    B, T, in_d = x.shape
    H = params["weight_hh_l0"].shape[0]
    out_d = params["fc_weight"].shape[0]
    H2 = 2 * H

    def round_up(a, m):
        return (a + m - 1) // m * m

    # ---- batch block sizing (batch lives on lanes; block = multiple of 128) -
    try:
        vmem_cap = int(pltpu.get_tpu_info().vmem_capacity_bytes)
    except Exception:
        vmem_cap = 64 * 1024 * 1024            # conservative (v7x per-TC)
    # per lane-column VMEM bytes: x block (in_d sublane-padded to 8, double
    # buffered), proj scratch (resident for whole block), lens/out blocks.
    bytes_per_col = 4 * (2 * T * round_up(in_d, 8) + T * H2 + 4 * 8)
    budget = int(0.35 * vmem_cap)
    b_cap = max(LANE, (budget // max(bytes_per_col, 1)) // LANE * LANE)
    B_lane = round_up(B, LANE)
    B_BLK = int(min(B_lane, 512, b_cap))
    # v7x megacore: keep >=2 blocks on the parallel batch axis when B permits
    if B_lane >= 2 * LANE and B_BLK >= B_lane:
        B_BLK = max(LANE, (B_lane // 2) // LANE * LANE)
    B_pad = round_up(B_lane, B_BLK)

    # ---- inputs: time-major, features on sublanes, batch on lanes -----------
    x_t = jnp.transpose(x.astype(jnp.float32), (1, 2, 0))        # (T, in_d, B)
    x_t = jnp.pad(x_t, ((0, 0), (0, 0), (0, B_pad - B)))
    lens = jnp.pad(lengths.astype(jnp.int32).reshape(1, B),
                   ((0, 0), (0, B_pad - B)))                     # padded cols: len 0 -> h stays 0

    # ---- weights: weight-on-left orientation, fwd/bwd stacked ---------------
    f32 = jnp.float32
    wih = jnp.concatenate([params["weight_ih_l0"],
                           params["weight_ih_l0_reverse"]], axis=0).astype(f32)  # (2H, in_d)
    whh = jnp.zeros((H2, H2), f32)
    whh = whh.at[:H, :H].set(params["weight_hh_l0"].astype(f32))
    whh = whh.at[H:, H:].set(params["weight_hh_l0_reverse"].astype(f32))
    bih = jnp.concatenate([
        params["bias_ih_l0"] + params["bias_hh_l0"],
        params["bias_ih_l0_reverse"] + params["bias_hh_l0_reverse"],
    ]).astype(f32).reshape(H2, 1)
    wfc = params["fc_weight"].astype(f32)                        # (out_d, 2H)
    bfc = params["fc_bias"].astype(f32).reshape(out_d, 1)

    est_block_bytes = bytes_per_col * B_BLK + (1 << 20)          # + weights/temps slop
    vmem_limit = int(min(vmem_cap, max(2 * est_block_bytes, 16 * 1024 * 1024)))

    grid = (B_pad // B_BLK,)
    out = pl.pallas_call(
        _bidir_rnn_kernel,
        out_shape=jax.ShapeDtypeStruct((out_d, B_pad), jnp.float32),
        grid=grid,
        in_specs=[
            pl.BlockSpec((T, in_d, B_BLK), lambda i: (0, 0, i)),   # x, batch on lanes
            pl.BlockSpec((1, B_BLK), lambda i: (0, i)),            # lengths
            pl.BlockSpec((H2, in_d), lambda i: (0, 0)),            # W_ih (fwd|bwd stacked)
            pl.BlockSpec((H2, H2), lambda i: (0, 0)),              # W_hh (block-diag)
            pl.BlockSpec((H2, 1), lambda i: (0, 0)),               # b_ih + b_hh
            pl.BlockSpec((out_d, H2), lambda i: (0, 0)),           # W_fc
            pl.BlockSpec((out_d, 1), lambda i: (0, 0)),            # b_fc
        ],
        out_specs=pl.BlockSpec((out_d, B_BLK), lambda i: (0, i)),
        scratch_shapes=[pltpu.VMEM((T, H2, B_BLK), jnp.float32)],  # hoisted projection
        compiler_params=pltpu.CompilerParams(
            dimension_semantics=("parallel",),
            vmem_limit_bytes=vmem_limit),
    )(x_t, lens, wih, whh, bih, wfc, bfc)
    return jnp.transpose(out[:, :B])                               # (B, out_d)


def init_params(key, in_d=IN_D, hidden_d=HIDDEN_D, out_d=OUT_D):
    """Deterministic synthetic params, same shapes as torch nn.RNN(bidirectional)+Linear."""
    ks = jax.random.split(key, 10)
    k = 1.0 / np.sqrt(hidden_d)
    kf = 1.0 / np.sqrt(2 * hidden_d)
    u = lambda kk, shape, s: jax.random.uniform(kk, shape, jnp.float32, -s, s)
    return {
        "weight_ih_l0":         u(ks[0], (hidden_d, in_d), k),
        "weight_hh_l0":         u(ks[1], (hidden_d, hidden_d), k),
        "bias_ih_l0":           u(ks[2], (hidden_d,), k),
        "bias_hh_l0":           u(ks[3], (hidden_d,), k),
        "weight_ih_l0_reverse": u(ks[4], (hidden_d, in_d), k),
        "weight_hh_l0_reverse": u(ks[5], (hidden_d, hidden_d), k),
        "bias_ih_l0_reverse":   u(ks[6], (hidden_d,), k),
        "bias_hh_l0_reverse":   u(ks[7], (hidden_d,), k),
        "fc_weight":            u(ks[8], (out_d, 2 * hidden_d), kf),
        "fc_bias":              u(ks[9], (out_d,), kf),
    }


def ref_forward(x, lengths, params):
    """Pure-JAX reference reproducing the packed bidirectional RNN + FC."""
    B, T, _ = x.shape
    H = params["weight_hh_l0"].shape[0]
    lens = lengths.astype(jnp.int32)[:, None]

    def run(suffix, time_order):
        Wih = params["weight_ih_l0" + suffix]
        Whh = params["weight_hh_l0" + suffix]
        b = params["bias_ih_l0" + suffix] + params["bias_hh_l0" + suffix]
        h = jnp.zeros((B, H), jnp.float32)
        for t in time_order:
            h_new = jnp.tanh(x[:, t] @ Wih.T + h @ Whh.T + b)
            h = jnp.where(lens > t, h_new, h)
        return h

    h_fwd = run("", range(T))
    h_bwd = run("_reverse", range(T - 1, -1, -1))
    last = jnp.concatenate([h_fwd, h_bwd], axis=-1)
    return last @ params["fc_weight"].T + params["fc_bias"]


if __name__ == "__main__":
    key = jax.random.PRNGKey(0)
    kp, kx = jax.random.split(key)
    params = init_params(kp)

    B, T = 2, 8
    x = jax.random.normal(kx, (B, T, IN_D), dtype=jnp.float32)
    lengths = jnp.array([8, 5], dtype=jnp.int32)   # variable lengths (padded seqs)

    y = coord_rnn_forward(x, lengths, params)
    jax.block_until_ready(y)

    y_ref = ref_forward(x, lengths, params)
    np.testing.assert_allclose(np.asarray(y), np.asarray(y_ref), rtol=1e-5, atol=1e-5)
    print("KERNEL_OK")
</pallas_src>

<mosaic_0001>
module attributes {stable_mosaic.version = 11 : i64} {
  func.func @_bidir_rnn_kernel(%arg0: i32, %arg1: memref<8x2x128xf32, #tpu.memory_space<vmem>>, %arg2: memref<1x128xi32, #tpu.memory_space<vmem>>, %arg3: memref<16x2xf32, #tpu.memory_space<vmem>>, %arg4: memref<16x16xf32, #tpu.memory_space<vmem>>, %arg5: memref<16x1xf32, #tpu.memory_space<vmem>>, %arg6: memref<2x16xf32, #tpu.memory_space<vmem>>, %arg7: memref<2x1xf32, #tpu.memory_space<vmem>>, %arg8: memref<2x128xf32, #tpu.memory_space<vmem>>, %arg9: memref<8x16x128xf32, #tpu.memory_space<vmem>>) attributes {dimension_semantics = [#tpu.dimension_semantics<parallel>], iteration_bounds = array<i64: 1>, scalar_prefetch = 0 : i64, scratch_operands = 1 : i64, tpu.core_type = #tpu.core_type<tc>, window_params = [{transform_indices = @transform_0, window_bounds = array<i64: 8, 2, 128>}, {transform_indices = @transform_1, window_bounds = array<i64: 1, 128>}, {pipeline_mode = #tpu.pipeline_mode<synchronous>, transform_indices = @transform_2, window_bounds = array<i64: 16, 2>}, {pipeline_mode = #tpu.pipeline_mode<synchronous>, transform_indices = @transform_3, window_bounds = array<i64: 16, 16>}, {pipeline_mode = #tpu.pipeline_mode<synchronous>, transform_indices = @transform_4, window_bounds = array<i64: 16, 1>}, {pipeline_mode = #tpu.pipeline_mode<synchronous>, transform_indices = @transform_5, window_bounds = array<i64: 2, 16>}, {pipeline_mode = #tpu.pipeline_mode<synchronous>, transform_indices = @transform_6, window_bounds = array<i64: 2, 1>}, {transform_indices = @transform_7, window_bounds = array<i64: 2, 128>}]} {
    %c0 = arith.constant 0 : index
    %c0_0 = arith.constant 0 : index
    %0 = vector.load %arg3[%c0, %c0_0] : memref<16x2xf32, #tpu.memory_space<vmem>>, vector<16x2xf32>
    %c0_1 = arith.constant 0 : index
    %c0_2 = arith.constant 0 : index
    %1 = vector.load %arg4[%c0_1, %c0_2] : memref<16x16xf32, #tpu.memory_space<vmem>>, vector<16x16xf32>
    %c0_3 = arith.constant 0 : index
    %c0_4 = arith.constant 0 : index
    %2 = vector.load %arg5[%c0_3, %c0_4] : memref<16x1xf32, #tpu.memory_space<vmem>>, vector<16x1xf32>
    %c0_5 = arith.constant 0 : index
    %c0_6 = arith.constant 0 : index
    %c0_7 = arith.constant 0 : index
    %3 = vector.load %arg1[%c0_5, %c0_6, %c0_7] : memref<8x2x128xf32, #tpu.memory_space<vmem>>, vector<1x2x128xf32>
    %4 = vector.shape_cast %3 : vector<1x2x128xf32> to vector<2x128xf32>
    %cst = arith.constant dense<0.000000e+00> : vector<16x128xf32>
    %5 = tpu.matmul %0, %4, %cst {dimension_numbers = #tpu.dot_dimension_numbers<[1], [0], [0], [1], [0, 0, 1, 1], [], []>} : vector<16x2xf32>, vector<2x128xf32>, vector<16x128xf32> -> vector<16x128xf32>
    %6 = vector.broadcast %2 : vector<16x1xf32> to vector<16x128xf32>
    %7 = arith.addf %5, %6 : vector<16x128xf32>
    %8 = vector.extract_strided_slice %7 {offsets = [0, 0], sizes = [8, 128], strides = [1, 1]} : vector<16x128xf32> to vector<8x128xf32>
    %c0_8 = arith.constant 0 : index
    %c0_9 = arith.constant 0 : index
    %c0_10 = arith.constant 0 : index
    %9 = vector.load %arg9[%c0_8, %c0_9, %c0_10] : memref<8x16x128xf32, #tpu.memory_space<vmem>>, vector<1x8x128xf32>
    %10 = vector.shape_cast %9 : vector<1x8x128xf32> to vector<8x128xf32>
    %11 = vector.shape_cast %8 : vector<8x128xf32> to vector<1x8x128xf32>
    tpu.vector_store %arg9[%c0_8, %c0_9, %c0_10], %11 {strides = array<i32>} : memref<8x16x128xf32, #tpu.memory_space<vmem>>, vector<1x8x128xf32>,
    %12 = vector.extract_strided_slice %7 {offsets = [8, 0], sizes = [8, 128], strides = [1, 1]} : vector<16x128xf32> to vector<8x128xf32>
    %c7 = arith.constant 7 : index
    %c8 = arith.constant 8 : index
    %c0_11 = arith.constant 0 : index
    %13 = vector.load %arg9[%c7, %c8, %c0_11] : memref<8x16x128xf32, #tpu.memory_space<vmem>>, vector<1x8x128xf32>
    %14 = vector.shape_cast %13 : vector<1x8x128xf32> to vector<8x128xf32>
    %15 = vector.shape_cast %12 : vector<8x128xf32> to vector<1x8x128xf32>
    tpu.vector_store %arg9[%c7, %c8, %c0_11], %15 {strides = array<i32>} : memref<8x16x128xf32, #tpu.memory_space<vmem>>, vector<1x8x128xf32>,
    %c1 = arith.constant 1 : index
    %c0_12 = arith.constant 0 : index
    %c0_13 = arith.constant 0 : index
    %16 = vector.load %arg1[%c1, %c0_12, %c0_13] : memref<8x2x128xf32, #tpu.memory_space<vmem>>, vector<1x2x128xf32>
    %17 = vector.shape_cast %16 : vector<1x2x128xf32> to vector<2x128xf32>
    %cst_14 = arith.constant dense<0.000000e+00> : vector<16x128xf32>
    %18 = tpu.matmul %0, %17, %cst_14 {dimension_numbers = #tpu.dot_dimension_numbers<[1], [0], [0], [1], [0, 0, 1, 1], [], []>} : vector<16x2xf32>, vector<2x128xf32>, vector<16x128xf32> -> vector<16x128xf32>
    %19 = vector.broadcast %2 : vector<16x1xf32> to vector<16x128xf32>
    %20 = arith.addf %18, %19 : vector<16x128xf32>
    %21 = vector.extract_strided_slice %20 {offsets = [0, 0], sizes = [8, 128], strides = [1, 1]} : vector<16x128xf32> to vector<8x128xf32>
    %c1_15 = arith.constant 1 : index
    %c0_16 = arith.constant 0 : index
    %c0_17 = arith.constant 0 : index
    %22 = vector.load %arg9[%c1_15, %c0_16, %c0_17] : memref<8x16x128xf32, #tpu.memory_space<vmem>>, vector<1x8x128xf32>
    %23 = vector.shape_cast %22 : vector<1x8x128xf32> to vector<8x128xf32>
    %24 = vector.shape_cast %21 : vector<8x128xf32> to vector<1x8x128xf32>
    tpu.vector_store %arg9[%c1_15, %c0_16, %c0_17], %24 {strides = array<i32>} : memref<8x16x128xf32, #tpu.memory_space<vmem>>, vector<1x8x128xf32>,
    %25 = vector.extract_strided_slice %20 {offsets = [8, 0], sizes = [8, 128], strides = [1, 1]} : vector<16x128xf32> to vector<8x128xf32>
    %c6 = arith.constant 6 : index
    %c8_18 = arith.constant 8 : index
    %c0_19 = arith.constant 0 : index
    %26 = vector.load %arg9[%c6, %c8_18, %c0_19] : memref<8x16x128xf32, #tpu.memory_space<vmem>>, vector<1x8x128xf32>
    %27 = vector.shape_cast %26 : vector<1x8x128xf32> to vector<8x128xf32>
    %28 = vector.shape_cast %25 : vector<8x128xf32> to vector<1x8x128xf32>
    tpu.vector_store %arg9[%c6, %c8_18, %c0_19], %28 {strides = array<i32>} : memref<8x16x128xf32, #tpu.memory_space<vmem>>, vector<1x8x128xf32>,
    %c2 = arith.constant 2 : index
    %c0_20 = arith.constant 0 : index
    %c0_21 = arith.constant 0 : index
    %29 = vector.load %arg1[%c2, %c0_20, %c0_21] : memref<8x2x128xf32, #tpu.memory_space<vmem>>, vector<1x2x128xf32>
    %30 = vector.shape_cast %29 : vector<1x2x128xf32> to vector<2x128xf32>
    %cst_22 = arith.constant dense<0.000000e+00> : vector<16x128xf32>
    %31 = tpu.matmul %0, %30, %cst_22 {dimension_numbers = #tpu.dot_dimension_numbers<[1], [0], [0], [1], [0, 0, 1, 1], [], []>} : vector<16x2xf32>, vector<2x128xf32>, vector<16x128xf32> -> vector<16x128xf32>
    %32 = vector.broadcast %2 : vector<16x1xf32> to vector<16x128xf32>
    %33 = arith.addf %31, %32 : vector<16x128xf32>
    %34 = vector.extract_strided_slice %33 {offsets = [0, 0], sizes = [8, 128], strides = [1, 1]} : vector<16x128xf32> to vector<8x128xf32>
    %c2_23 = arith.constant 2 : index
    %c0_24 = arith.constant 0 : index
    %c0_25 = arith.constant 0 : index
    %35 = vector.load %arg9[%c2_23, %c0_24, %c0_25] : memref<8x16x128xf32, #tpu.memory_space<vmem>>, vector<1x8x128xf32>
    %36 = vector.shape_cast %35 : vector<1x8x128xf32> to vector<8x128xf32>
    %37 = vector.shape_cast %34 : vector<8x128xf32> to vector<1x8x128xf32>
    tpu.vector_store %arg9[%c2_23, %c0_24, %c0_25], %37 {strides = array<i32>} : memref<8x16x128xf32, #tpu.memory_space<vmem>>, vector<1x8x128xf32>,
    %38 = vector.extract_strided_slice %33 {offsets = [8, 0], sizes = [8, 128], strides = [1, 1]} : vector<16x128xf32> to vector<8x128xf32>
    %c5 = arith.constant 5 : index
    %c8_26 = arith.constant 8 : index
    %c0_27 = arith.constant 0 : index
    %39 = vector.load %arg9[%c5, %c8_26, %c0_27] : memref<8x16x128xf32, #tpu.memory_space<vmem>>, vector<1x8x128xf32>
    %40 = vector.shape_cast %39 : vector<1x8x128xf32> to vector<8x128xf32>
    %41 = vector.shape_cast %38 : vector<8x128xf32> to vector<1x8x128xf32>
    tpu.vector_store %arg9[%c5, %c8_26, %c0_27], %41 {strides = array<i32>} : memref<8x16x128xf32, #tpu.memory_space<vmem>>, vector<1x8x128xf32>,
    %c3 = arith.constant 3 : index
    %c0_28 = arith.constant 0 : index
    %c0_29 = arith.constant 0 : index
    %42 = vector.load %arg1[%c3, %c0_28, %c0_29] : memref<8x2x128xf32, #tpu.memory_space<vmem>>, vector<1x2x128xf32>
    %43 = vector.shape_cast %42 : vector<1x2x128xf32> to vector<2x128xf32>
    %cst_30 = arith.constant dense<0.000000e+00> : vector<16x128xf32>
    %44 = tpu.matmul %0, %43, %cst_30 {dimension_numbers = #tpu.dot_dimension_numbers<[1], [0], [0], [1], [0, 0, 1, 1], [], []>} : vector<16x2xf32>, vector<2x128xf32>, vector<16x128xf32> -> vector<16x128xf32>
    %45 = vector.broadcast %2 : vector<16x1xf32> to vector<16x128xf32>
    %46 = arith.addf %44, %45 : vector<16x128xf32>
    %47 = vector.extract_strided_slice %46 {offsets = [0, 0], sizes = [8, 128], strides = [1, 1]} : vector<16x128xf32> to vector<8x128xf32>
    %c3_31 = arith.constant 3 : index
    %c0_32 = arith.constant 0 : index
    %c0_33 = arith.constant 0 : index
    %48 = vector.load %arg9[%c3_31, %c0_32, %c0_33] : memref<8x16x128xf32, #tpu.memory_space<vmem>>, vector<1x8x128xf32>
    %49 = vector.shape_cast %48 : vector<1x8x128xf32> to vector<8x128xf32>
    %50 = vector.shape_cast %47 : vector<8x128xf32> to vector<1x8x128xf32>
    tpu.vector_store %arg9[%c3_31, %c0_32, %c0_33], %50 {strides = array<i32>} : memref<8x16x128xf32, #tpu.memory_space<vmem>>, vector<1x8x128xf32>,
    %51 = vector.extract_strided_slice %46 {offsets = [8, 0], sizes = [8, 128], strides = [1, 1]} : vector<16x128xf32> to vector<8x128xf32>
    %c4 = arith.constant 4 : index
    %c8_34 = arith.constant 8 : index
    %c0_35 = arith.constant 0 : index
    %52 = vector.load %arg9[%c4, %c8_34, %c0_35] : memref<8x16x128xf32, #tpu.memory_space<vmem>>, vector<1x8x128xf32>
    %53 = vector.shape_cast %52 : vector<1x8x128xf32> to vector<8x128xf32>
    %54 = vector.shape_cast %51 : vector<8x128xf32> to vector<1x8x128xf32>
    tpu.vector_store %arg9[%c4, %c8_34, %c0_35], %54 {strides = array<i32>} : memref<8x16x128xf32, #tpu.memory_space<vmem>>, vector<1x8x128xf32>,
    %c4_36 = arith.constant 4 : index
    %c0_37 = arith.constant 0 : index
    %c0_38 = arith.constant 0 : index
    %55 = vector.load %arg1[%c4_36, %c0_37, %c0_38] : memref<8x2x128xf32, #tpu.memory_space<vmem>>, vector<1x2x128xf32>
    %56 = vector.shape_cast %55 : vector<1x2x128xf32> to vector<2x128xf32>
    %cst_39 = arith.constant dense<0.000000e+00> : vector<16x128xf32>
    %57 = tpu.matmul %0, %56, %cst_39 {dimension_numbers = #tpu.dot_dimension_numbers<[1], [0], [0], [1], [0, 0, 1, 1], [], []>} : vector<16x2xf32>, vector<2x128xf32>, vector<16x128xf32> -> vector<16x128xf32>
    %58 = vector.broadcast %2 : vector<16x1xf32> to vector<16x128xf32>
    %59 = arith.addf %57, %58 : vector<16x128xf32>
    %60 = vector.extract_strided_slice %59 {offsets = [0, 0], sizes = [8, 128], strides = [1, 1]} : vector<16x128xf32> to vector<8x128xf32>
    %c4_40 = arith.constant 4 : index
    %c0_41 = arith.constant 0 : index
    %c0_42 = arith.constant 0 : index
    %61 = vector.load %arg9[%c4_40, %c0_41, %c0_42] : memref<8x16x128xf32, #tpu.memory_space<vmem>>, vector<1x8x128xf32>
    %62 = vector.shape_cast %61 : vector<1x8x128xf32> to vector<8x128xf32>
    %63 = vector.shape_cast %60 : vector<8x128xf32> to vector<1x8x128xf32>
    tpu.vector_store %arg9[%c4_40, %c0_41, %c0_42], %63 {strides = array<i32>} : memref<8x16x128xf32, #tpu.memory_space<vmem>>, vector<1x8x128xf32>,
    %64 = vector.extract_strided_slice %59 {offsets = [8, 0], sizes = [8, 128], strides = [1, 1]} : vector<16x128xf32> to vector<8x128xf32>
    %c3_43 = arith.constant 3 : index
    %c8_44 = arith.constant 8 : index
    %c0_45 = arith.constant 0 : index
    %65 = vector.load %arg9[%c3_43, %c8_44, %c0_45] : memref<8x16x128xf32, #tpu.memory_space<vmem>>, vector<1x8x128xf32>
    %66 = vector.shape_cast %65 : vector<1x8x128xf32> to vector<8x128xf32>
    %67 = vector.shape_cast %64 : vector<8x128xf32> to vector<1x8x128xf32>
    tpu.vector_store %arg9[%c3_43, %c8_44, %c0_45], %67 {strides = array<i32>} : memref<8x16x128xf32, #tpu.memory_space<vmem>>, vector<1x8x128xf32>,
    %c5_46 = arith.constant 5 : index
    %c0_47 = arith.constant 0 : index
    %c0_48 = arith.constant 0 : index
    %68 = vector.load %arg1[%c5_46, %c0_47, %c0_48] : memref<8x2x128xf32, #tpu.memory_space<vmem>>, vector<1x2x128xf32>
    %69 = vector.shape_cast %68 : vector<1x2x128xf32> to vector<2x128xf32>
    %cst_49 = arith.constant dense<0.000000e+00> : vector<16x128xf32>
    %70 = tpu.matmul %0, %69, %cst_49 {dimension_numbers = #tpu.dot_dimension_numbers<[1], [0], [0], [1], [0, 0, 1, 1], [], []>} : vector<16x2xf32>, vector<2x128xf32>, vector<16x128xf32> -> vector<16x128xf32>
    %71 = vector.broadcast %2 : vector<16x1xf32> to vector<16x128xf32>
    %72 = arith.addf %70, %71 : vector<16x128xf32>
    %73 = vector.extract_strided_slice %72 {offsets = [0, 0], sizes = [8, 128], strides = [1, 1]} : vector<16x128xf32> to vector<8x128xf32>
    %c5_50 = arith.constant 5 : index
    %c0_51 = arith.constant 0 : index
    %c0_52 = arith.constant 0 : index
    %74 = vector.load %arg9[%c5_50, %c0_51, %c0_52] : memref<8x16x128xf32, #tpu.memory_space<vmem>>, vector<1x8x128xf32>
    %75 = vector.shape_cast %74 : vector<1x8x128xf32> to vector<8x128xf32>
    %76 = vector.shape_cast %73 : vector<8x128xf32> to vector<1x8x128xf32>
    tpu.vector_store %arg9[%c5_50, %c0_51, %c0_52], %76 {strides = array<i32>} : memref<8x16x128xf32, #tpu.memory_space<vmem>>, vector<1x8x128xf32>,
    %77 = vector.extract_strided_slice %72 {offsets = [8, 0], sizes = [8, 128], strides = [1, 1]} : vector<16x128xf32> to vector<8x128xf32>
    %c2_53 = arith.constant 2 : index
    %c8_54 = arith.constant 8 : index
    %c0_55 = arith.constant 0 : index
    %78 = vector.load %arg9[%c2_53, %c8_54, %c0_55] : memref<8x16x128xf32, #tpu.memory_space<vmem>>, vector<1x8x128xf32>
    %79 = vector.shape_cast %78 : vector<1x8x128xf32> to vector<8x128xf32>
    %80 = vector.shape_cast %77 : vector<8x128xf32> to vector<1x8x128xf32>
    tpu.vector_store %arg9[%c2_53, %c8_54, %c0_55], %80 {strides = array<i32>} : memref<8x16x128xf32, #tpu.memory_space<vmem>>, vector<1x8x128xf32>,
    %c6_56 = arith.constant 6 : index
    %c0_57 = arith.constant 0 : index
    %c0_58 = arith.constant 0 : index
    %81 = vector.load %arg1[%c6_56, %c0_57, %c0_58] : memref<8x2x128xf32, #tpu.memory_space<vmem>>, vector<1x2x128xf32>
    %82 = vector.shape_cast %81 : vector<1x2x128xf32> to vector<2x128xf32>
    %cst_59 = arith.constant dense<0.000000e+00> : vector<16x128xf32>
    %83 = tpu.matmul %0, %82, %cst_59 {dimension_numbers = #tpu.dot_dimension_numbers<[1], [0], [0], [1], [0, 0, 1, 1], [], []>} : vector<16x2xf32>, vector<2x128xf32>, vector<16x128xf32> -> vector<16x128xf32>
    %84 = vector.broadcast %2 : vector<16x1xf32> to vector<16x128xf32>
    %85 = arith.addf %83, %84 : vector<16x128xf32>
    %86 = vector.extract_strided_slice %85 {offsets = [0, 0], sizes = [8, 128], strides = [1, 1]} : vector<16x128xf32> to vector<8x128xf32>
    %c6_60 = arith.constant 6 : index
    %c0_61 = arith.constant 0 : index
    %c0_62 = arith.constant 0 : index
    %87 = vector.load %arg9[%c6_60, %c0_61, %c0_62] : memref<8x16x128xf32, #tpu.memory_space<vmem>>, vector<1x8x128xf32>
    %88 = vector.shape_cast %87 : vector<1x8x128xf32> to vector<8x128xf32>
    %89 = vector.shape_cast %86 : vector<8x128xf32> to vector<1x8x128xf32>
    tpu.vector_store %arg9[%c6_60, %c0_61, %c0_62], %89 {strides = array<i32>} : memref<8x16x128xf32, #tpu.memory_space<vmem>>, vector<1x8x128xf32>,
    %90 = vector.extract_strided_slice %85 {offsets = [8, 0], sizes = [8, 128], strides = [1, 1]} : vector<16x128xf32> to vector<8x128xf32>
    %c1_63 = arith.constant 1 : index
    %c8_64 = arith.constant 8 : index
    %c0_65 = arith.constant 0 : index
    %91 = vector.load %arg9[%c1_63, %c8_64, %c0_65] : memref<8x16x128xf32, #tpu.memory_space<vmem>>, vector<1x8x128xf32>
    %92 = vector.shape_cast %91 : vector<1x8x128xf32> to vector<8x128xf32>
    %93 = vector.shape_cast %90 : vector<8x128xf32> to vector<1x8x128xf32>
    tpu.vector_store %arg9[%c1_63, %c8_64, %c0_65], %93 {strides = array<i32>} : memref<8x16x128xf32, #tpu.memory_space<vmem>>, vector<1x8x128xf32>,
    %c7_66 = arith.constant 7 : index
    %c0_67 = arith.constant 0 : index
    %c0_68 = arith.constant 0 : index
    %94 = vector.load %arg1[%c7_66, %c0_67, %c0_68] : memref<8x2x128xf32, #tpu.memory_space<vmem>>, vector<1x2x128xf32>
    %95 = vector.shape_cast %94 : vector<1x2x128xf32> to vector<2x128xf32>
    %cst_69 = arith.constant dense<0.000000e+00> : vector<16x128xf32>
    %96 = tpu.matmul %0, %95, %cst_69 {dimension_numbers = #tpu.dot_dimension_numbers<[1], [0], [0], [1], [0, 0, 1, 1], [], []>} : vector<16x2xf32>, vector<2x128xf32>, vector<16x128xf32> -> vector<16x128xf32>
    %97 = vector.broadcast %2 : vector<16x1xf32> to vector<16x128xf32>
    %98 = arith.addf %96, %97 : vector<16x128xf32>
    %99 = vector.extract_strided_slice %98 {offsets = [0, 0], sizes = [8, 128], strides = [1, 1]} : vector<16x128xf32> to vector<8x128xf32>
    %c7_70 = arith.constant 7 : index
    %c0_71 = arith.constant 0 : index
    %c0_72 = arith.constant 0 : index
    %100 = vector.load %arg9[%c7_70, %c0_71, %c0_72] : memref<8x16x128xf32, #tpu.memory_space<vmem>>, vector<1x8x128xf32>
    %101 = vector.shape_cast %100 : vector<1x8x128xf32> to vector<8x128xf32>
    %102 = vector.shape_cast %99 : vector<8x128xf32> to vector<1x8x128xf32>
    tpu.vector_store %arg9[%c7_70, %c0_71, %c0_72], %102 {strides = array<i32>} : memref<8x16x128xf32, #tpu.memory_space<vmem>>, vector<1x8x128xf32>,
    %103 = vector.extract_strided_slice %98 {offsets = [8, 0], sizes = [8, 128], strides = [1, 1]} : vector<16x128xf32> to vector<8x128xf32>
    %c0_73 = arith.constant 0 : index
    %c8_74 = arith.constant 8 : index
    %c0_75 = arith.constant 0 : index
    %104 = vector.load %arg9[%c0_73, %c8_74, %c0_75] : memref<8x16x128xf32, #tpu.memory_space<vmem>>, vector<1x8x128xf32>
    %105 = vector.shape_cast %104 : vector<1x8x128xf32> to vector<8x128xf32>
    %106 = vector.shape_cast %103 : vector<8x128xf32> to vector<1x8x128xf32>
    tpu.vector_store %arg9[%c0_73, %c8_74, %c0_75], %106 {strides = array<i32>} : memref<8x16x128xf32, #tpu.memory_space<vmem>>, vector<1x8x128xf32>,
    %107 = tpu.iota {dimensions = array<i32: 0>} : vector<16x128xi32>
    %c8_i32 = arith.constant 8 : i32
    %108 = vector.broadcast %c8_i32 : i32 to vector<16x128xi32>
    %109 = arith.cmpi slt, %107, %108 : vector<16x128xi32>
    %c0_76 = arith.constant 0 : index
    %c0_77 = arith.constant 0 : index
    %110 = vector.load %arg2[%c0_76, %c0_77] : memref<1x128xi32, #tpu.memory_space<vmem>>, vector<1x128xi32>
    %cst_78 = arith.constant 0.000000e+00 : f32
    %111 = vector.broadcast %cst_78 : f32 to vector<16x128xf32>
    %c0_i32 = arith.constant 0 : i32
    %c7_i32 = arith.constant 7 : i32
    %112 = vector.broadcast %c0_i32 : i32 to vector<16x128xi32>
    %113 = vector.broadcast %c7_i32 : i32 to vector<16x128xi32>
    %114 = arith.select %109, %112, %113 : vector<16x128xi1>, vector<16x128xi32>
    %c0_79 = arith.constant 0 : index
    %c0_80 = arith.constant 0 : index
    %c0_81 = arith.constant 0 : index
    %115 = vector.load %arg9[%c0_79, %c0_80, %c0_81] : memref<8x16x128xf32, #tpu.memory_space<vmem>>, vector<1x16x128xf32>
    %116 = vector.shape_cast %115 : vector<1x16x128xf32> to vector<16x128xf32>
    %cst_82 = arith.constant dense<0.000000e+00> : vector<16x128xf32>
    %117 = tpu.matmul %1, %111, %cst_82 {dimension_numbers = #tpu.dot_dimension_numbers<[1], [0], [0], [1], [0, 0, 1, 1], [], []>} : vector<16x16xf32>, vector<16x128xf32>, vector<16x128xf32> -> vector<16x128xf32>
    %118 = arith.addf %116, %117 : vector<16x128xf32>
    %119 = math.tanh %118 : vector<16x128xf32>
    %120 = vector.broadcast %110 : vector<1x128xi32> to vector<16x128xi32>
    %121 = arith.cmpi sgt, %120, %114 : vector<16x128xi32>
    %122 = arith.select %121, %119, %111 : vector<16x128xi1>, vector<16x128xf32>
    %c1_i32 = arith.constant 1 : i32
    %c6_i32 = arith.constant 6 : i32
    %123 = vector.broadcast %c1_i32 : i32 to vector<16x128xi32>
    %124 = vector.broadcast %c6_i32 : i32 to vector<16x128xi32>
    %125 = arith.select %109, %123, %124 : vector<16x128xi1>, vector<16x128xi32>
    %c1_83 = arith.constant 1 : index
    %c0_84 = arith.constant 0 : index
    %c0_85 = arith.constant 0 : index
    %126 = vector.load %arg9[%c1_83, %c0_84, %c0_85] : memref<8x16x128xf32, #tpu.memory_space<vmem>>, vector<1x16x128xf32>
    %127 = vector.shape_cast %126 : vector<1x16x128xf32> to vector<16x128xf32>
    %cst_86 = arith.constant dense<0.000000e+00> : vector<16x128xf32>
    %128 = tpu.matmul %1, %122, %cst_86 {dimension_numbers = #tpu.dot_dimension_numbers<[1], [0], [0], [1], [0, 0, 1, 1], [], []>} : vector<16x16xf32>, vector<16x128xf32>, vector<16x128xf32> -> vector<16x128xf32>
    %129 = arith.addf %127, %128 : vector<16x128xf32>
    %130 = math.tanh %129 : vector<16x128xf32>
    %131 = vector.broadcast %110 : vector<1x128xi32> to vector<16x128xi32>
    %132 = arith.cmpi sgt, %131, %125 : vector<16x128xi32>
    %133 = arith.select %132, %130, %122 : vector<16x128xi1>, vector<16x128xf32>
    %c2_i32 = arith.constant 2 : i32
    %c5_i32 = arith.constant 5 : i32
    %134 = vector.broadcast %c2_i32 : i32 to vector<16x128xi32>
    %135 = vector.broadcast %c5_i32 : i32 to vector<16x128xi32>
    %136 = arith.select %109, %134, %135 : vector<16x128xi1>, vector<16x128xi32>
    %c2_87 = arith.constant 2 : index
    %c0_88 = arith.constant 0 : index
    %c0_89 = arith.constant 0 : index
    %137 = vector.load %arg9[%c2_87, %c0_88, %c0_89] : memref<8x16x128xf32, #tpu.memory_space<vmem>>, vector<1x16x128xf32>
    %138 = vector.shape_cast %137 : vector<1x16x128xf32> to vector<16x128xf32>
    %cst_90 = arith.constant dense<0.000000e+00> : vector<16x128xf32>
    %139 = tpu.matmul %1, %133, %cst_90 {dimension_numbers = #tpu.dot_dimension_numbers<[1], [0], [0], [1], [0, 0, 1, 1], [], []>} : vector<16x16xf32>, vector<16x128xf32>, vector<16x128xf32> -> vector<16x128xf32>
    %140 = arith.addf %138, %139 : vector<16x128xf32>
    %141 = math.tanh %140 : vector<16x128xf32>
    %142 = vector.broadcast %110 : vector<1x128xi32> to vector<16x128xi32>
    %143 = arith.cmpi sgt, %142, %136 : vector<16x128xi32>
    %144 = arith.select %143, %141, %133 : vector<16x128xi1>, vector<16x128xf32>
    %c3_i32 = arith.constant 3 : i32
    %c4_i32 = arith.constant 4 : i32
    %145 = vector.broadcast %c3_i32 : i32 to vector<16x128xi32>
    %146 = vector.broadcast %c4_i32 : i32 to vector<16x128xi32>
    %147 = arith.select %109, %145, %146 : vector<16x128xi1>, vector<16x128xi32>
    %c3_91 = arith.constant 3 : index
    %c0_92 = arith.constant 0 : index
    %c0_93 = arith.constant 0 : index
    %148 = vector.load %arg9[%c3_91, %c0_92, %c0_93] : memref<8x16x128xf32, #tpu.memory_space<vmem>>, vector<1x16x128xf32>
    %149 = vector.shape_cast %148 : vector<1x16x128xf32> to vector<16x128xf32>
    %cst_94 = arith.constant dense<0.000000e+00> : vector<16x128xf32>
    %150 = tpu.matmul %1, %144, %cst_94 {dimension_numbers = #tpu.dot_dimension_numbers<[1], [0], [0], [1], [0, 0, 1, 1], [], []>} : vector<16x16xf32>, vector<16x128xf32>, vector<16x128xf32> -> vector<16x128xf32>
    %151 = arith.addf %149, %150 : vector<16x128xf32>
    %152 = math.tanh %151 : vector<16x128xf32>
    %153 = vector.broadcast %110 : vector<1x128xi32> to vector<16x128xi32>
    %154 = arith.cmpi sgt, %153, %147 : vector<16x128xi32>
    %155 = arith.select %154, %152, %144 : vector<16x128xi1>, vector<16x128xf32>
    %c4_i32_95 = arith.constant 4 : i32
    %c3_i32_96 = arith.constant 3 : i32
    %156 = vector.broadcast %c4_i32_95 : i32 to vector<16x128xi32>
    %157 = vector.broadcast %c3_i32_96 : i32 to vector<16x128xi32>
    %158 = arith.select %109, %156, %157 : vector<16x128xi1>, vector<16x128xi32>
    %c4_97 = arith.constant 4 : index
    %c0_98 = arith.constant 0 : index
    %c0_99 = arith.constant 0 : index
    %159 = vector.load %arg9[%c4_97, %c0_98, %c0_99] : memref<8x16x128xf32, #tpu.memory_space<vmem>>, vector<1x16x128xf32>
    %160 = vector.shape_cast %159 : vector<1x16x128xf32> to vector<16x128xf32>
    %cst_100 = arith.constant dense<0.000000e+00> : vector<16x128xf32>
    %161 = tpu.matmul %1, %155, %cst_100 {dimension_numbers = #tpu.dot_dimension_numbers<[1], [0], [0], [1], [0, 0, 1, 1], [], []>} : vector<16x16xf32>, vector<16x128xf32>, vector<16x128xf32> -> vector<16x128xf32>
    %162 = arith.addf %160, %161 : vector<16x128xf32>
    %163 = math.tanh %162 : vector<16x128xf32>
    %164 = vector.broadcast %110 : vector<1x128xi32> to vector<16x128xi32>
    %165 = arith.cmpi sgt, %164, %158 : vector<16x128xi32>
    %166 = arith.select %165, %163, %155 : vector<16x128xi1>, vector<16x128xf32>
    %c5_i32_101 = arith.constant 5 : i32
    %c2_i32_102 = arith.constant 2 : i32
    %167 = vector.broadcast %c5_i32_101 : i32 to vector<16x128xi32>
    %168 = vector.broadcast %c2_i32_102 : i32 to vector<16x128xi32>
    %169 = arith.select %109, %167, %168 : vector<16x128xi1>, vector<16x128xi32>
    %c5_103 = arith.constant 5 : index
    %c0_104 = arith.constant 0 : index
    %c0_105 = arith.constant 0 : index
    %170 = vector.load %arg9[%c5_103, %c0_104, %c0_105] : memref<8x16x128xf32, #tpu.memory_space<vmem>>, vector<1x16x128xf32>
    %171 = vector.shape_cast %170 : vector<1x16x128xf32> to vector<16x128xf32>
    %cst_106 = arith.constant dense<0.000000e+00> : vector<16x128xf32>
    %172 = tpu.matmul %1, %166, %cst_106 {dimension_numbers = #tpu.dot_dimension_numbers<[1], [0], [0], [1], [0, 0, 1, 1], [], []>} : vector<16x16xf32>, vector<16x128xf32>, vector<16x128xf32> -> vector<16x128xf32>
    %173 = arith.addf %171, %172 : vector<16x128xf32>
    %174 = math.tanh %173 : vector<16x128xf32>
    %175 = vector.broadcast %110 : vector<1x128xi32> to vector<16x128xi32>
    %176 = arith.cmpi sgt, %175, %169 : vector<16x128xi32>
    %177 = arith.select %176, %174, %166 : vector<16x128xi1>, vector<16x128xf32>
    %c6_i32_107 = arith.constant 6 : i32
    %c1_i32_108 = arith.constant 1 : i32
    %178 = vector.broadcast %c6_i32_107 : i32 to vector<16x128xi32>
    %179 = vector.broadcast %c1_i32_108 : i32 to vector<16x128xi32>
    %180 = arith.select %109, %178, %179 : vector<16x128xi1>, vector<16x128xi32>
    %c6_109 = arith.constant 6 : index
    %c0_110 = arith.constant 0 : index
    %c0_111 = arith.constant 0 : index
    %181 = vector.load %arg9[%c6_109, %c0_110, %c0_111] : memref<8x16x128xf32, #tpu.memory_space<vmem>>, vector<1x16x128xf32>
    %182 = vector.shape_cast %181 : vector<1x16x128xf32> to vector<16x128xf32>
    %cst_112 = arith.constant dense<0.000000e+00> : vector<16x128xf32>
    %183 = tpu.matmul %1, %177, %cst_112 {dimension_numbers = #tpu.dot_dimension_numbers<[1], [0], [0], [1], [0, 0, 1, 1], [], []>} : vector<16x16xf32>, vector<16x128xf32>, vector<16x128xf32> -> vector<16x128xf32>
    %184 = arith.addf %182, %183 : vector<16x128xf32>
    %185 = math.tanh %184 : vector<16x128xf32>
    %186 = vector.broadcast %110 : vector<1x128xi32> to vector<16x128xi32>
    %187 = arith.cmpi sgt, %186, %180 : vector<16x128xi32>
    %188 = arith.select %187, %185, %177 : vector<16x128xi1>, vector<16x128xf32>
    %c7_i32_113 = arith.constant 7 : i32
    %c0_i32_114 = arith.constant 0 : i32
    %189 = vector.broadcast %c7_i32_113 : i32 to vector<16x128xi32>
    %190 = vector.broadcast %c0_i32_114 : i32 to vector<16x128xi32>
    %191 = arith.select %109, %189, %190 : vector<16x128xi1>, vector<16x128xi32>
    %c7_115 = arith.constant 7 : index
    %c0_116 = arith.constant 0 : index
    %c0_117 = arith.constant 0 : index
    %192 = vector.load %arg9[%c7_115, %c0_116, %c0_117] : memref<8x16x128xf32, #tpu.memory_space<vmem>>, vector<1x16x128xf32>
    %193 = vector.shape_cast %192 : vector<1x16x128xf32> to vector<16x128xf32>
    %cst_118 = arith.constant dense<0.000000e+00> : vector<16x128xf32>
    %194 = tpu.matmul %1, %188, %cst_118 {dimension_numbers = #tpu.dot_dimension_numbers<[1], [0], [0], [1], [0, 0, 1, 1], [], []>} : vector<16x16xf32>, vector<16x128xf32>, vector<16x128xf32> -> vector<16x128xf32>
    %195 = arith.addf %193, %194 : vector<16x128xf32>
    %196 = math.tanh %195 : vector<16x128xf32>
    %197 = vector.broadcast %110 : vector<1x128xi32> to vector<16x128xi32>
    %198 = arith.cmpi sgt, %197, %191 : vector<16x128xi32>
    %199 = arith.select %198, %196, %188 : vector<16x128xi1>, vector<16x128xf32>
    %c0_119 = arith.constant 0 : index
    %c0_120 = arith.constant 0 : index
    %200 = vector.load %arg6[%c0_119, %c0_120] : memref<2x16xf32, #tpu.memory_space<vmem>>, vector<2x16xf32>
    %c0_121 = arith.constant 0 : index
    %c0_122 = arith.constant 0 : index
    %201 = vector.load %arg7[%c0_121, %c0_122] : memref<2x1xf32, #tpu.memory_space<vmem>>, vector<2x1xf32>
    %cst_123 = arith.constant dense<0.000000e+00> : vector<2x128xf32>
    %202 = tpu.matmul %200, %199, %cst_123 {dimension_numbers = #tpu.dot_dimension_numbers<[1], [0], [0], [1], [0, 0, 1, 1], [], []>} : vector<2x16xf32>, vector<16x128xf32>, vector<2x128xf32> -> vector<2x128xf32>
    %203 = vector.broadcast %201 : vector<2x1xf32> to vector<2x128xf32>
    %204 = arith.addf %202, %203 : vector<2x128xf32>
    %c0_124 = arith.constant 0 : index
    %c0_125 = arith.constant 0 : index
    %205 = vector.load %arg8[%c0_124, %c0_125] : memref<2x128xf32, #tpu.memory_space<vmem>>, vector<2x128xf32>
    tpu.vector_store %arg8[%c0_124, %c0_125], %204 {strides = array<i32>} : memref<2x128xf32, #tpu.memory_space<vmem>>, vector<2x128xf32>,
    return
  }
  func.func @transform_0(%arg0: i32) -> (i32, i32, i32) {
    %c0_i32 = arith.constant 0 : i32
    %c0_i32_0 = arith.constant 0 : i32
    %c0_i32_1 = arith.constant 0 : i32
    return %c0_i32, %c0_i32_0, %arg0 : i32, i32, i32
  }
  func.func @transform_1(%arg0: i32) -> (i32, i32) {
    %c0_i32 = arith.constant 0 : i32
    %c0_i32_0 = arith.constant 0 : i32
    return %c0_i32, %arg0 : i32, i32
  }
  func.func @transform_2(%arg0: i32) -> (i32, i32) {
    %c0_i32 = arith.constant 0 : i32
    %c0_i32_0 = arith.constant 0 : i32
    %c0_i32_1 = arith.constant 0 : i32
    return %c0_i32, %c0_i32_0 : i32, i32
  }
  func.func @transform_3(%arg0: i32) -> (i32, i32) {
    %c0_i32 = arith.constant 0 : i32
    %c0_i32_0 = arith.constant 0 : i32
    %c0_i32_1 = arith.constant 0 : i32
    return %c0_i32, %c0_i32_0 : i32, i32
  }
  func.func @transform_4(%arg0: i32) -> (i32, i32) {
    %c0_i32 = arith.constant 0 : i32
    %c0_i32_0 = arith.constant 0 : i32
    %c0_i32_1 = arith.constant 0 : i32
    return %c0_i32, %c0_i32_0 : i32, i32
  }
  func.func @transform_5(%arg0: i32) -> (i32, i32) {
    %c0_i32 = arith.constant 0 : i32
    %c0_i32_0 = arith.constant 0 : i32
    %c0_i32_1 = arith.constant 0 : i32
    return %c0_i32, %c0_i32_0 : i32, i32
  }
  func.func @transform_6(%arg0: i32) -> (i32, i32) {
    %c0_i32 = arith.constant 0 : i32
    %c0_i32_0 = arith.constant 0 : i32
    %c0_i32_1 = arith.constant 0 : i32
    return %c0_i32, %c0_i32_0 : i32, i32
  }
  func.func @transform_7(%arg0: i32) -> (i32, i32) {
    %c0_i32 = arith.constant 0 : i32
    %c0_i32_0 = arith.constant 0 : i32
    return %c0_i32, %arg0 : i32, i32
  }
}

</mosaic_0001>

<bundles_post_ra>
// kernel: tpu_custom_call.1
= control target key start
LH: loop header
LB: loop body
LE: loop exit
PB: predicated region body
PF: predicated region fallthrough
CT: control target
= control target key end

     0   :  { %vm51_vm0 = vcmask 1041408   ;;  %vm44_vm1 = vcmask 15360   ;;  %s2093_s0 = inlined_call_operand.vmem [shape: f32[8,2,128], index: 0, kind: input, shape index: {}]   ;;  %s2094_s1 = inlined_call_operand.vmem [shape: s32[1,128], index: 1, kind: input, shape index: {}]   ;;  %s2095_s2 = inlined_call_operand.vmem [shape: f32[16,2], index: 2, kind: input, shape index: {}]   ;;  %s2096_s3 = inlined_call_operand.vmem [shape: f32[16,16], index: 3, kind: input, shape index: {}]   ;;  %s2097_s4 = inlined_call_operand.vmem [shape: f32[16,1], index: 4, kind: input, shape index: {}]   ;;  %s2098_s5 = inlined_call_operand.vmem [shape: f32[2,16], index: 5, kind: input, shape index: {}]   ;;  %s2099_s6 = inlined_call_operand.vmem [shape: f32[2,1], index: 6, kind: input, shape index: {}]   ;;  %s2100_s7 = inlined_call_operand.hbm [shape: f32[2,128], index: 7, kind: output, shape index: {}]  }
   0x1   :  { %v33_v0 = vld [vmem:[%s2093_s0] sm:$0x3]  ;;  %v1524_v1 = vld [vmem:[%s2093_s0 + $0x2] sm:$0x3]  ;;  %v28_v3 = vld [vmem:[%s2095_s2 + $0x8] sm:$0xff] }
   0x2   :  { %v27_v2 = vld [vmem:[%s2095_s2] sm:$0xff]  ;;  %1630 = vmatprep.subr.msk.mxu0 %vm51_vm0, %v33_v0  ;;  %1635 = vmatprep.subr.msk.mxu1 %vm51_vm0, %v1524_v1 }
   0x3   :  { %1631 = vmatpush3.msk.msra.mxu0 %vm51_vm0, %v33_v0  ;;  %1632 = vmatprep.mubr.msk.f32.mxu0 %vm44_vm1, %v27_v2  ;;  %v1528_v4 = vld [vmem:[%s2093_s0 + $0x4] sm:$0x3]  ;;  %v1532_v5 = vld [vmem:[%s2093_s0 + $0x6] sm:$0x3] }
   0x4   :  { %1636 = vmatpush3.msk.msra.mxu1 %vm51_vm0, %v1524_v1  ;;  %1637 = vmatprep.mubr.msk.f32.mxu1 %vm44_vm1, %v27_v2 }
   0x5   :  { %1633 = vmatmul.mubr.msk.f32.vlgmr.msra.gmra.mrb[0].mxu0 %vm44_vm1, %v28_v3  ;;  %1638 = vmatmul.mubr.msk.f32.vlgmr.msra.gmra.mrb[0].mxu1 %vm44_vm1, %v28_v3 }
   0x6   :  { %12 = vsyncpa [#allocation4], 0  ;;  %1640 = vmatprep.subr.msk.mxu0 %vm51_vm0, %v1528_v4  ;;  %1645 = vmatprep.subr.msk.mxu1 %vm51_vm0, %v1532_v5  ;;  %v1536_v6 = vld [vmem:[%s2093_s0 + $0x8] sm:$0x3]  ;;  %v1540_v7 = vld [vmem:[%s2093_s0 + $0xa] sm:$0x3] }
   0x7   :  { %1641 = vmatpush3.msk.msra.mxu0 %vm51_vm0, %v1528_v4  ;;  %1642 = vmatprep.mubr.msk.f32.mxu0 %vm44_vm1, %v27_v2  ;;  %v1544_v8 = vld [vmem:[%s2093_s0 + $0xc] sm:$0x3]  ;;  %v1548_v9 = vld [vmem:[%s2093_s0 + $0xe] sm:$0x3]  ;;  %v1933_v10 = vld [vmem:[%s2096_s3] sm:$0xff]  ;;  %vm723_vm2 = vcmask 130048  }
   0x8   :  { %1646 = vmatpush3.msk.msra.mxu1 %vm51_vm0, %v1532_v5  ;;  %1647 = vmatprep.mubr.msk.f32.mxu1 %vm44_vm1, %v27_v2  ;;  %v31_v11 = vld [vmem:[%s2097_s4] sm:$0xff]  ;;  %v1827_v12 = vmov 0.0   ;;  %v1948_v13 = vld [vmem:[%s2096_s3 + $0x8] sm:$0xff]  ;;  %v1828_v14 = vmov 0   ;;  %vm1830_vm12 = vmmov 0   ;;  %s1831_s29 = smov [#allocation3]  }
   0x9   :  { %1643 = vmatmul.mubr.msk.f32.vlgmr.msra.gmra.mrb[2].mxu0 %vm44_vm1, %v28_v3  ;;  %1648 = vmatmul.mubr.msk.f32.vlgmr.msra.gmra.mrb[2].mxu1 %vm44_vm1, %v28_v3  ;;  %v32_v15 = vld [vmem:[%s2097_s4 + $0x8] sm:$0xff]  ;;  %v1986_v47 = vld [vmem:[%s2094_s1] ss:$0 sm:$0xff]  ;;  %s1513_s30 = sshll.u32 %s1831_s29, 4  ;;  %s1514_s30 = int_to_ptr.vmem [resolvable:$true] %s1513_s30 }
   0xa   :  { %1650 = vmatprep.subr.msk.mxu0 %vm51_vm0, %v1536_v6  ;;  %1655 = vmatprep.subr.msk.mxu1 %vm51_vm0, %v1540_v7  ;;  %vm813_vm3 = vcmp.gt.s32.totalorder %v1986_v47, 0  ;;  %vm814_vm4 = vcmp.gt.s32.totalorder %v1986_v47, 7  ;;  %vm901_vm6 = vcmp.gt.s32.totalorder %v1986_v47, 6  ;;  %vm900_vm7 = vcmp.gt.s32.totalorder %v1986_v47, 1  ;;  %s1803_s8 = scalar_lea.vmem %s1514_s30, 32  ;;  %p1808_p1 = scmp.lt.s32.totalorder %s1514_s30, %s1514_s30 }
   0xb   :  { %1651 = vmatpush3.msk.msra.mxu0 %vm51_vm0, %v1536_v6  ;;  %1652 = vmatprep.mubr.msk.f32.mxu0 %vm44_vm1, %v27_v2  ;;  %vm1732_vm5 = vmpackc.low %vm814_vm4, %vm813_vm3  ;;  %vm988_vm8 = vcmp.gt.s32.totalorder %v1986_v47, 5  ;;  %vm987_vm9 = vcmp.gt.s32.totalorder %v1986_v47, 2  ;;  %vm1075_vm10 = vcmp.gt.s32.totalorder %v1986_v47, 4  ;;  %vm1074_vm11 = vcmp.gt.s32.totalorder %v1986_v47, 3  ;;  %p1804_p0 = scmp.ne.s32.totalorder %s1514_s30, %s1803_s8  ;;  %p1809_p2 = scmp.lt.s32.totalorder %s1803_s8, %s1803_s8 }
   0xc   :  { %1656 = vmatpush3.msk.msra.mxu1 %vm51_vm0, %v1540_v7  ;;  %1657 = vmatprep.mubr.msk.f32.mxu1 %vm44_vm1, %v27_v2 }
   0xd   :  { %1653 = vmatmul.mubr.msk.f32.vlgmr.msra.gmra.mrb[4].mxu0 %vm44_vm1, %v28_v3  ;;  %1658 = vmatmul.mubr.msk.f32.vlgmr.msra.gmra.mrb[4].mxu1 %vm44_vm1, %v28_v3  ;;  %p1810_p3 = por %p1809_p2, %p1808_p1 }
   0xe   :  { %1660 = vmatprep.subr.msk.mxu0 %vm51_vm0, %v1544_v8  ;;  %1665 = vmatprep.subr.msk.mxu1 %vm51_vm0, %v1548_v9 }
   0xf   :  { %1661 = vmatpush3.msk.msra.mxu0 %vm51_vm0, %v1544_v8  ;;  %1662 = vmatprep.mubr.msk.f32.mxu0 %vm44_vm1, %v27_v2  ;;  %p1811_p4 = pnand %p1810_p3, %p1804_p0 }
  0x10   :  { %1666 = vmatpush3.msk.msra.mxu1 %vm51_vm0, %v1548_v9  ;;  %1667 = vmatprep.mubr.msk.f32.mxu1 %vm44_vm1, %v27_v2 }
  0x11   :  { %1663 = vmatmul.mubr.msk.f32.vlgmr.msra.gmra.mrb[6].mxu0 %vm44_vm1, %v28_v3  ;;  %1668 = vmatmul.mubr.msk.f32.vlgmr.msra.gmra.mrb[6].mxu1 %vm44_vm1, %v28_v3 }
  0x12   :  { %1670 = vmatprep.subr.mxu0 %v1827_v12  ;;  %1672 = vmatprep.mubr.msk.f32.mxu0 %vm723_vm2, %v1933_v10 }
  0x13   :  { %1671 = vmatpush3.msra.mxu0 %v1827_v12  ;;  %1769 = vset.pattern.permute.xlu0 %v1828_v14 }
  0x14   :  { %36 = vperm.xlu0 %1769, %v31_v11   ;;  %1679 = vmatprep.mubr.msk.f32.mxu1 %vm723_vm2, %v1933_v10 }
  0x15   :  { %1673 = vmatmul.mubr.msk.f32.vlgmr.msra.gmra.mrb[8].mxu0 %vm723_vm2, %v1948_v13  ;;  %1770 = vset.pattern.permute.xlu1 %v1828_v14 }
  0x16   :  { %1686 = vmatprep.mubr.msk.f32.mxu0 %vm723_vm2, %v1933_v10 }
  0x18   :  { %41 = vperm.xlu0 %1769, %v32_v15  }
  0x93   :  { %v1960_v16 = vpop.permute.xlu0 %36 }
  0x97   :  { %v42_v17 = vpop.permute.xlu0 %41 }
  0xd8   :  { %v1634_v18 = vpop.f32.mrb[0].mxu0  ;;  %v1639_v19 = vpop.f32.mrb[0].mxu1 }
  0xd9   :  { %v1962_v20 = vadd.f32 %v1634_v18, %v42_v17  ;;  %v121_v21 = vpop.f32.mrb[1].mxu0  ;;  %v1964_v22 = vadd.f32 %v1639_v19, %v42_v17  ;;  %v204_v23 = vpop.f32.mrb[1].mxu1 }
  0xda   :  { %v122_v42 = vadd.f32 %v121_v21, %v1960_v16  ;;  %v205_v51 = vadd.f32 %v204_v23, %v1960_v16 }
  0xdc   :  { %v1644_v24 = vpop.f32.mrb[2].mxu0  ;;  %v1649_v25 = vpop.f32.mrb[2].mxu1 }
  0xdd   :  { %v1966_v26 = vadd.f32 %v1644_v24, %v42_v17  ;;  %v288_v27 = vpop.f32.mrb[3].mxu0  ;;  %v1968_v28 = vadd.f32 %v1649_v25, %v42_v17  ;;  %v1970_v29 = vpop.f32.mrb[3].mxu1 }
  0xde   :  { %v289_v63 = vadd.f32 %v288_v27, %v1960_v16  ;;  %v373_v9 = vadd.f32 %v1970_v29, %v1960_v16 }
  0xe0   :  { %v1654_v30 = vpop.f32.mrb[4].mxu0  ;;  %v1659_v31 = vpop.f32.mrb[4].mxu1 }
  0xe1   :  { %v1972_v32 = vadd.f32 %v1654_v30, %v42_v17  ;;  %v1974_v33 = vpop.f32.mrb[5].mxu0  ;;  %v544_v34 = vadd.f32 %v1659_v31, %v42_v17  ;;  %v1976_v35 = vpop.f32.mrb[5].mxu1 }
  0xe2   :  { %v457_v25 = vadd.f32 %v1974_v33, %v1960_v16 }
  0xe4   :  { %v1664_v36 = vpop.f32.mrb[6].mxu0  ;;  %v1669_v37 = vpop.f32.mrb[6].mxu1 }
  0xe5   :  { %v626_v38 = vadd.f32 %v1664_v36, %v42_v17  ;;  %v1978_v39 = vpop.f32.mrb[7].mxu0  ;;  %v1980_v40 = vpop.f32.mrb[7].mxu1  ;;  %v708_v41 = vadd.f32 %v1669_v37, %v42_v17 }
  0xe8   :  { %v1674_v43 = vpop.f32.mrb[8].mxu0 }
  0xe9   :  { %v806_v44 = vadd.f32 %v1674_v43, %v708_v41  ;;  %v796_v45 = vpop.f32.mrb[9].mxu0 }
  0xea   :  { %v805_v46 = vadd.f32 %v796_v45, %v122_v42 }
  0xeb   :  { %1771 = vtanh.f32 %v806_v44 }
  0xec   :  { %1773 = vtanh.f32 %v805_v46 }
  0xf5   :  { %v1772_v48 = vpop.eup %1771 }
  0xf6   :  { %v1774_v49 = vpop.eup %1773  ;;  %v816_v57 = vsel %vm814_vm4, %v1772_v48, 0.0 }
  0xf7   :  { %v1731_v50 = vpack.c.bf16 %v1772_v48, %v1774_v49  ;;  %v815_v59 = vsel %vm813_vm3, %v1774_v49, 0.0 }
  0xf9   :  { %1733 = vmatprep.subr.msk.bf16.mxu1 %vm1732_vm5, %v1731_v50 }
  0xfa   :  { %1736 = vmatpush3.bf16.msk.msra.mxu1 %vm1732_vm5, %v1731_v50 }
  0xfd   :  { %1680 = vmatmul.mubr.msk.f32.vlgmr.msra.gmra.mrb[8].mxu1 %vm723_vm2, %v1948_v13 }
  0xfe   :  { %1693 = vmatprep.mubr.msk.f32.mxu1 %vm723_vm2, %v1933_v10 }
 0x1d0   :  { %v1681_v52 = vpop.f32.mrb[8].mxu1 }
 0x1d1   :  { %v897_v53 = vadd.f32 %v1681_v52, %v626_v38  ;;  %v887_v54 = vpop.f32.mrb[9].mxu1 }
 0x1d2   :  { %v896_v55 = vadd.f32 %v887_v54, %v205_v51 }
 0x1d3   :  { %1775 = vtanh.f32 %v897_v53 }
 0x1d4   :  { %1777 = vtanh.f32 %v896_v55 }
 0x1dd   :  { %v1776_v56 = vpop.eup %1775 }
 0x1de   :  { %v1778_v58 = vpop.eup %1777  ;;  %v903_v60 = vsel %vm901_vm6, %v1776_v56, %v816_v57  ;;  %v703_v57 = vadd.f32 %v1980_v40, %v1960_v16 }
 0x1df   :  { %v902_v61 = vsel %vm900_vm7, %v1778_v58, %v815_v59 }
 0x1e0   :  { %v1737_v62 = vpack.c.bf16 %v903_v60, %v902_v61 }
 0x1e2   :  { %1738 = vmatprep.subr.bf16.mxu0 %v1737_v62 }
 0x1e3   :  { %1740 = vmatpush3.bf16.msra.mxu0 %v1737_v62 }
 0x1e6   :  { %1687 = vmatmul.mubr.msk.f32.vlgmr.msra.gmra.mrb[10].mxu0 %vm723_vm2, %v1948_v13 }
 0x1e7   :  { %1700 = vmatprep.mubr.msk.f32.mxu0 %vm723_vm2, %v1933_v10 }
 0x2b9   :  { %v1688_v0 = vpop.f32.mrb[10].mxu0 }
 0x2ba   :  { %v984_v1 = vadd.f32 %v1688_v0, %v544_v34  ;;  %v974_v2 = vpop.f32.mrb[11].mxu0 }
 0x2bb   :  { %v983_v3 = vadd.f32 %v974_v2, %v289_v63 }
 0x2bc   :  { %1779 = vtanh.f32 %v984_v1 }
 0x2bd   :  { %1781 = vtanh.f32 %v983_v3 }
 0x2c6   :  { %v1780_v4 = vpop.eup %1779 }
 0x2c7   :  { %v1782_v5 = vpop.eup %1781  ;;  %v990_v6 = vsel %vm988_vm8, %v1780_v4, %v903_v60 }
 0x2c8   :  { %v989_v7 = vsel %vm987_vm9, %v1782_v5, %v902_v61 }
 0x2c9   :  { %v1741_v8 = vpack.c.bf16 %v990_v6, %v989_v7 }
 0x2cb   :  { %1742 = vmatprep.subr.bf16.mxu1 %v1741_v8 }
 0x2cc   :  { %1744 = vmatpush3.bf16.msra.mxu1 %v1741_v8 }
 0x2cf   :  { %1694 = vmatmul.mubr.msk.f32.vlgmr.msra.gmra.mrb[10].mxu1 %vm723_vm2, %v1948_v13 }
 0x2d0   :  { %1707 = vmatprep.mubr.msk.f32.mxu1 %vm723_vm2, %v1933_v10 }
 0x3a2   :  { %v1695_v11 = vpop.f32.mrb[10].mxu1 }
 0x3a3   :  { %v1071_v14 = vadd.f32 %v1695_v11, %v1972_v32  ;;  %v1061_v15 = vpop.f32.mrb[11].mxu1 }
 0x3a4   :  { %v1070_v17 = vadd.f32 %v1061_v15, %v373_v9 }
 0x3a5   :  { %1783 = vtanh.f32 %v1071_v14 }
 0x3a6   :  { %1785 = vtanh.f32 %v1070_v17 }
 0x3af   :  { %v1784_v18 = vpop.eup %1783 }
 0x3b0   :  { %v1786_v19 = vpop.eup %1785  ;;  %v1077_v21 = vsel %vm1075_vm10, %v1784_v18, %v990_v6 }
 0x3b1   :  { %v1076_v23 = vsel %vm1074_vm11, %v1786_v19, %v989_v7 }
 0x3b2   :  { %v1745_v24 = vpack.c.bf16 %v1077_v21, %v1076_v23 }
 0x3b4   :  { %1746 = vmatprep.subr.bf16.mxu0 %v1745_v24 }
 0x3b5   :  { %1748 = vmatpush3.bf16.msra.mxu0 %v1745_v24 }
 0x3b8   :  { %1701 = vmatmul.mubr.msk.f32.vlgmr.msra.gmra.mrb[12].mxu0 %vm723_vm2, %v1948_v13 }
 0x3b9   :  { %1714 = vmatprep.mubr.msk.f32.mxu0 %vm723_vm2, %v1933_v10 }
 0x48b   :  { %v1702_v27 = vpop.f32.mrb[12].mxu0 }
 0x48c   :  { %v1158_v29 = vadd.f32 %v1702_v27, %v1968_v28  ;;  %v1148_v30 = vpop.f32.mrb[13].mxu0  ;;  %v539_v28 = vadd.f32 %v1976_v35, %v1960_v16 }
 0x48d   :  { %v1157_v31 = vadd.f32 %v1148_v30, %v457_v25 }
 0x48e   :  { %1787 = vtanh.f32 %v1158_v29 }
 0x48f   :  { %1789 = vtanh.f32 %v1157_v31 }
 0x498   :  { %v1788_v32 = vpop.eup %1787 }
 0x499   :  { %v1790_v34 = vpop.eup %1789  ;;  %v1164_v36 = vsel %vm1074_vm11, %v1788_v32, %v1077_v21 }
 0x49a   :  { %v1163_v37 = vsel %vm1075_vm10, %v1790_v34, %v1076_v23 }
 0x49b   :  { %v1749_v38 = vpack.c.bf16 %v1164_v36, %v1163_v37 }
 0x49d   :  { %1750 = vmatprep.subr.bf16.mxu1 %v1749_v38 }
 0x49e   :  { %1752 = vmatpush3.bf16.msra.mxu1 %v1749_v38 }
 0x4a1   :  { %1708 = vmatmul.mubr.msk.f32.vlgmr.msra.gmra.mrb[12].mxu1 %vm723_vm2, %v1948_v13 }
 0x4a2   :  { %1721 = vmatprep.mubr.msk.f32.mxu1 %vm723_vm2, %v1933_v10  ;;  %v621_v10 = vadd.f32 %v1978_v39, %v1960_v16  ;;  %v1829_v39 = vmov 0.0|0.0   ;;  %v1426_v16 = vld [vmem:[%s2098_s5] sm:$0x3] }
 0x574   :  { %v1709_v33 = vpop.f32.mrb[12].mxu1 }
 0x575   :  { %v1245_v41 = vadd.f32 %v1709_v33, %v1966_v26  ;;  %v1235_v42 = vpop.f32.mrb[13].mxu1 }
 0x576   :  { %v1244_v43 = vadd.f32 %v1235_v42, %v539_v28 }
 0x577   :  { %1791 = vtanh.f32 %v1245_v41 }
 0x578   :  { %1793 = vtanh.f32 %v1244_v43 }
 0x581   :  { %v1792_v44 = vpop.eup %1791 }
 0x582   :  { %v1794_v45 = vpop.eup %1793  ;;  %v1251_v46 = vsel %vm987_vm9, %v1792_v44, %v1164_v36 }
 0x583   :  { %v1250_v48 = vsel %vm988_vm8, %v1794_v45, %v1163_v37 }
 0x584   :  { %v1753_v49 = vpack.c.bf16 %v1251_v46, %v1250_v48 }
 0x586   :  { %1754 = vmatprep.subr.bf16.mxu0 %v1753_v49 }
 0x587   :  { %1756 = vmatpush3.bf16.msra.mxu0 %v1753_v49 }
 0x588   :  { %1761 = vmatprep.subr.bf16.mxu0 %v1829_v39 }
 0x58a   :  { %1715 = vmatmul.mubr.msk.f32.vlgmr.msra.gmra.mrb[14].mxu0 %vm723_vm2, %v1948_v13 }
 0x58b   :  { %1728 = vmatprep.mubr.msk.f32.mxu0 %vm1830_vm12, %v1827_v12 }
 0x65d   :  { %v1716_v26 = vpop.f32.mrb[14].mxu0 }
 0x65e   :  { %v1332_v35 = vadd.f32 %v1716_v26, %v1964_v22  ;;  %v1322_v50 = vpop.f32.mrb[15].mxu0  ;;  %v1427_v22 = vld [vmem:[%s2099_s6] sm:$0x3] }
 0x65f   :  { %v1331_v51 = vadd.f32 %v1322_v50, %v621_v10  ;;  %1430 = vperm.xlu1 %1770, %v1427_v22  }
 0x660   :  { %1795 = vtanh.f32 %v1332_v35 }
 0x661   :  { %1797 = vtanh.f32 %v1331_v51 }
 0x66a   :  { %v1796_v52 = vpop.eup %1795 }
 0x66b   :  { %v1798_v53 = vpop.eup %1797  ;;  %v1338_v54 = vsel %vm900_vm7, %v1796_v52, %v1251_v46 }
 0x66c   :  { %v1337_v55 = vsel %vm901_vm6, %v1798_v53, %v1250_v48 }
 0x66d   :  { %v1757_v56 = vpack.c.bf16 %v1338_v54, %v1337_v55 }
 0x66f   :  { %1758 = vmatprep.subr.bf16.mxu1 %v1757_v56 }
 0x670   :  { %1760 = vmatpush3.bf16.msra.mxu1 %v1757_v56 }
 0x673   :  { %1722 = vmatmul.mubr.msk.f32.vlgmr.msra.gmra.mrb[14].mxu1 %vm723_vm2, %v1948_v13 }
 0x746   :  { %v1723_v58 = vpop.f32.mrb[14].mxu1 }
 0x747   :  { %v1419_v59 = vadd.f32 %v1723_v58, %v1962_v20  ;;  %v1409_v60 = vpop.f32.mrb[15].mxu1  ;;  %v1431_v20 = vpop.permute.xlu1 %1430 }
 0x748   :  { %v1418_v61 = vadd.f32 %v1409_v60, %v703_v57 }
 0x749   :  { %1799 = vtanh.f32 %v1419_v59 }
 0x74a   :  { %1801 = vtanh.f32 %v1418_v61 }
 0x753   :  { %v1800_v13 = vpop.eup %1799 }
 0x754   :  { %v1802_v62 = vpop.eup %1801  ;;  %v1425_v12 = vsel %vm813_vm3, %v1800_v13, %v1338_v54 }
 0x755   :  { %v1424_v63 = vsel %vm814_vm4, %v1802_v62, %v1337_v55 }
 0x756   :  { %v1762_v0 = vpack.c.bf16 %v1425_v12, %v1424_v63 }
 0x758   :  { %1763 = vmatpush3.bf16.msra.mxu0 %v1762_v0 }
 0x75b   :  { %1729 = vmatmul.mubr.msk.f32.vlgmr.msra.gmra.mrb[16].mxu0 %vm723_vm2, %v1426_v16 }
 0x82e   :  { %v1502_v40 = vpop.f32.mrb[16].mxu0 }
 0x82f   :  { %v1503_v1 = vadd.f32 %v1502_v40, %v1431_v20  ;;  %v1730_v2 = vpop.f32.mrb[17].mxu0 }
 0x831   :  { %1506 = vst [vmem:[#allocation3] sm:$0x3] %v1503_v1 }
 0x832   :  { %1814 = shalt.err (!%p1811_p4)
}
 0x833   :  { %s1815_s5 = scalar_lea.hbm %s2100_s7, 32 }
 0x834   :  { %p1816_p5 = scmp.ne.s32.totalorder %s2100_s7, %s1815_s5  ;;  %p1819_p6 = scmp.lt.u32.totalorder %s1815_s5, %s2100_s7 }
 0x836   :  { %p1821_p7 = pnand %p1819_p6, %p1816_p5 }
 0x838   :  { %1824 = shalt.err (!%p1821_p7)
}
 0x839   :  { %1516 = dma.vmem_to_hbm [thread:$0]  %s1514_s30, 32, %s2100_s7, [#allocation4]  }
 0x83a   :  { %1825 = dma.done.wait [#allocation4], 32  }
 0x83b   :  { %1826 = vsyncadd [#allocation4], 4294967264 }
 0x83c   :  { %1520 = vsyncpa [#allocation4], 1 }

</bundles_post_ra>
